<compile_context>
chip_gen: v6e
topology: v6e:2x2x1
jax: 0.10.0
libtpu: 0.0.40
codegen_flags: <defaults>
</compile_context>

<pallas_src>
import jax
import jax.numpy as jnp
from jax.experimental import pallas as pl
from jax.experimental.pallas import tpu as pltpu


def _round_up(x: int, m: int) -> int:
    return ((x + m - 1) // m) * m


def _channel_mlp_kernel(x_ref, w1_ref, w2_ref, o_ref):
    # x_ref : (1, C, tile_px)   pixel tile, pixels on the lane axis
    # w1_ref: (hidden, C)       full first conv weight
    # w2_ref: (C, hidden)       full second conv weight
    # o_ref : (1, C, tile_px)
    x = x_ref[0]                                                     # (C, tile_px)
    h = jnp.dot(w1_ref[...], x, preferred_element_type=jnp.float32)  # (hidden, tile_px)
    h = jnp.maximum(h, 0.0)                                          # ReLU
    y = jnp.dot(w2_ref[...], h, preferred_element_type=jnp.float32)  # (C, tile_px)
    o_ref[0] = y.astype(o_ref.dtype)


def _channel_mlp_call(x_bcp, w1, w2, *, tile_px, out_dtype):
    """x_bcp: (B, C, P_pad) with P_pad % tile_px == 0; w1: (hidden, C); w2: (C, hidden)."""
    b, c, p = x_bcp.shape
    hidden = w1.shape[0]
    assert p % tile_px == 0

    grid = (b, p // tile_px)
    flops = 4 * b * p * c * hidden  # two matmuls, 2*M*N*K each
    bytes_accessed = (
        x_bcp.size * x_bcp.dtype.itemsize
        + b * c * p * jnp.dtype(out_dtype).itemsize
        + w1.size * w1.dtype.itemsize
        + w2.size * w2.dtype.itemsize
    )

    return pl.pallas_call(
        _channel_mlp_kernel,
        out_shape=jax.ShapeDtypeStruct((b, c, p), out_dtype),
        grid_spec=pltpu.PrefetchScalarGridSpec(
            num_scalar_prefetch=0,
            grid=grid,
            in_specs=[
                pl.BlockSpec((1, c, tile_px), lambda i, j: (i, 0, j)),  # pixel tile
                pl.BlockSpec((hidden, c), lambda i, j: (0, 0)),         # full W1
                pl.BlockSpec((c, hidden), lambda i, j: (0, 0)),         # full W2
            ],
            out_specs=pl.BlockSpec((1, c, tile_px), lambda i, j: (i, 0, j)),
        ),
        compiler_params=pltpu.CompilerParams(
            dimension_semantics=("parallel", "parallel"),
        ),
        cost_estimate=pl.CostEstimate(
            flops=flops, transcendentals=0, bytes_accessed=bytes_accessed
        ),
    )(x_bcp, w1, w2)


def channel_mlp_forward(x_ncdhw, w1, w2, *, tile_px=512, compute_dtype=None):
    """Forward pass matching ChannelMLP.forward (bias=False).

    x_ncdhw: (B, C, D, H, W)
    w1     : (hidden, C)  -- Conv3d(C, hidden, 1, bias=False).weight squeezed
    w2     : (C, hidden)  -- Conv3d(hidden, C, 1, bias=False).weight squeezed
    compute_dtype: optional dtype (e.g. jnp.bfloat16) to cast inputs/weights to;
                   accumulation is always f32, output stays in x's dtype.
    returns (B, C, D, H, W) in x_ncdhw.dtype
    """
    b, c, d, h, w = x_ncdhw.shape
    p = d * h * w
    # Free reshape: pixels land on the last (lane) axis; no NCDHW<->NDHWC transpose.
    x_bcp = x_ncdhw.reshape(b, c, p)

    if compute_dtype is not None:
        x_bcp = x_bcp.astype(compute_dtype)
        w1 = w1.astype(compute_dtype)
        w2 = w2.astype(compute_dtype)

    # Clamp the tile so tiny inputs don't over-pad; keep it 128-lane aligned.
    tile = min(tile_px, _round_up(p, 128))
    p_pad = _round_up(p, tile)
    if p_pad != p:
        # Zero pad: zeros flow through W1 -> ReLU -> W2 as zeros and are sliced off.
        x_bcp = jnp.pad(x_bcp, ((0, 0), (0, 0), (0, p_pad - p)))

    y = _channel_mlp_call(x_bcp, w1, w2, tile_px=tile, out_dtype=x_ncdhw.dtype)

    if p_pad != p:
        y = y[:, :, :p]
    return y.reshape(b, c, d, h, w)


def _reference(x, w1, w2):
    # Pure-JAX reference, identical semantics to the PyTorch module.
    b, c, d, h, w = x.shape
    xr = jnp.transpose(x, (0, 2, 3, 4, 1)).reshape(-1, c)
    yr = jnp.maximum(xr @ w1.T, 0.0) @ w2.T
    return jnp.transpose(yr.reshape(b, d, h, w, c), (0, 4, 1, 2, 3))


if __name__ == "__main__":
    # Shapes consistent with the module (NCDHW input to 1x1x1 Conv3d blocks).
    B, C, D, H, W = 2, 4, 8, 16, 16          # P = D*H*W = 2048 pixels/batch -> grid (2, 4)
    reduction_ratio = 16
    hidden = max(8, C // reduction_ratio)    # -> 8

    key = jax.random.PRNGKey(0)
    kx, k1, k2 = jax.random.split(key, 3)

    x = jax.random.normal(kx, (B, C, D, H, W), dtype=jnp.float32)
    # Conv3d(kernel_size=1, bias=False) weights squeezed:
    w1 = jax.random.normal(k1, (hidden, C), dtype=jnp.float32) * (1.0 / jnp.sqrt(C))
    w2 = jax.random.normal(k2, (C, hidden), dtype=jnp.float32) * (1.0 / jnp.sqrt(hidden))

    # Main run (f32, lane-dense layout, 512-pixel tiles).
    y = jax.block_until_ready(channel_mlp_forward(x, w1, w2))
    ref = _reference(x, w1, w2)
    assert y.shape == x.shape
    assert jnp.allclose(y, ref, atol=1e-5, rtol=1e-5), "mismatch vs reference (f32)"

    # Ragged pixel count -> exercises the zero-padded tail tile path.
    x2 = jax.random.normal(kx, (B, C, 3, 7, 9), dtype=jnp.float32)   # P = 189
    y2 = jax.block_until_ready(channel_mlp_forward(x2, w1, w2))
    assert jnp.allclose(y2, _reference(x2, w1, w2), atol=1e-5, rtol=1e-5), \
        "mismatch vs reference (ragged)"

    # Optional bf16 input path (halves HBM bytes; f32 accumulation in-kernel).
    y_bf16 = jax.block_until_ready(
        channel_mlp_forward(x, w1, w2, compute_dtype=jnp.bfloat16)
    )
    assert jnp.allclose(y_bf16, ref, atol=5e-2, rtol=5e-2), "mismatch vs reference (bf16)"

    print("KERNEL_OK")
</pallas_src>

<mosaic_0001>
module attributes {stable_mosaic.version = 11 : i64} {
  func.func @_channel_mlp_kernel(%arg0: i32, %arg1: i32, %arg2: memref<1x4x512xf32, #tpu.memory_space<vmem>>, %arg3: memref<8x4xf32, #tpu.memory_space<vmem>>, %arg4: memref<4x8xf32, #tpu.memory_space<vmem>>, %arg5: memref<1x4x512xf32, #tpu.memory_space<vmem>>) attributes {dimension_semantics = [#tpu.dimension_semantics<parallel>, #tpu.dimension_semantics<parallel>], iteration_bounds = array<i64: 2, 4>, scalar_prefetch = 0 : i64, scratch_operands = 0 : i64, tpu.core_type = #tpu.core_type<tc>, window_params = [{transform_indices = @transform_0, window_bounds = array<i64: 1, 4, 512>}, {pipeline_mode = #tpu.pipeline_mode<synchronous>, transform_indices = @transform_1, window_bounds = array<i64: 8, 4>}, {pipeline_mode = #tpu.pipeline_mode<synchronous>, transform_indices = @transform_2, window_bounds = array<i64: 4, 8>}, {transform_indices = @transform_3, window_bounds = array<i64: 1, 4, 512>}]} {
    %c0 = arith.constant 0 : index
    %c0_0 = arith.constant 0 : index
    %c0_1 = arith.constant 0 : index
    %0 = vector.load %arg2[%c0, %c0_0, %c0_1] : memref<1x4x512xf32, #tpu.memory_space<vmem>>, vector<1x4x512xf32>
    %1 = vector.shape_cast %0 : vector<1x4x512xf32> to vector<4x512xf32>
    %c0_2 = arith.constant 0 : index
    %c0_3 = arith.constant 0 : index
    %2 = vector.load %arg3[%c0_2, %c0_3] : memref<8x4xf32, #tpu.memory_space<vmem>>, vector<8x4xf32>
    %cst = arith.constant dense<0.000000e+00> : vector<8x512xf32>
    %3 = tpu.matmul %2, %1, %cst {dimension_numbers = #tpu.dot_dimension_numbers<[1], [0], [0], [1], [0, 0, 1, 1], [], []>} : vector<8x4xf32>, vector<4x512xf32>, vector<8x512xf32> -> vector<8x512xf32>
    %cst_4 = arith.constant 0.000000e+00 : f32
    %4 = vector.broadcast %cst_4 : f32 to vector<8x512xf32>
    %5 = arith.maximumf %3, %4 : vector<8x512xf32>
    %c0_5 = arith.constant 0 : index
    %c0_6 = arith.constant 0 : index
    %6 = vector.load %arg4[%c0_5, %c0_6] : memref<4x8xf32, #tpu.memory_space<vmem>>, vector<4x8xf32>
    %cst_7 = arith.constant dense<0.000000e+00> : vector<4x512xf32>
    %7 = tpu.matmul %6, %5, %cst_7 {dimension_numbers = #tpu.dot_dimension_numbers<[1], [0], [0], [1], [0, 0, 1, 1], [], []>} : vector<4x8xf32>, vector<8x512xf32>, vector<4x512xf32> -> vector<4x512xf32>
    %c0_8 = arith.constant 0 : index
    %c0_9 = arith.constant 0 : index
    %c0_10 = arith.constant 0 : index
    %8 = vector.load %arg5[%c0_8, %c0_9, %c0_10] : memref<1x4x512xf32, #tpu.memory_space<vmem>>, vector<1x4x512xf32>
    %9 = vector.shape_cast %8 : vector<1x4x512xf32> to vector<4x512xf32>
    %10 = vector.shape_cast %7 : vector<4x512xf32> to vector<1x4x512xf32>
    tpu.vector_store %arg5[%c0_8, %c0_9, %c0_10], %10 {strides = array<i32>} : memref<1x4x512xf32, #tpu.memory_space<vmem>>, vector<1x4x512xf32>,
    return
  }
  func.func @transform_0(%arg0: i32, %arg1: i32) -> (i32, i32, i32) {
    %c0_i32 = arith.constant 0 : i32
    %c0_i32_0 = arith.constant 0 : i32
    return %arg0, %c0_i32, %arg1 : i32, i32, i32
  }
  func.func @transform_1(%arg0: i32, %arg1: i32) -> (i32, i32) {
    %c0_i32 = arith.constant 0 : i32
    %c0_i32_0 = arith.constant 0 : i32
    %c0_i32_1 = arith.constant 0 : i32
    return %c0_i32, %c0_i32_0 : i32, i32
  }
  func.func @transform_2(%arg0: i32, %arg1: i32) -> (i32, i32) {
    %c0_i32 = arith.constant 0 : i32
    %c0_i32_0 = arith.constant 0 : i32
    %c0_i32_1 = arith.constant 0 : i32
    return %c0_i32, %c0_i32_0 : i32, i32
  }
  func.func @transform_3(%arg0: i32, %arg1: i32) -> (i32, i32, i32) {
    %c0_i32 = arith.constant 0 : i32
    %c0_i32_0 = arith.constant 0 : i32
    return %arg0, %c0_i32, %arg1 : i32, i32, i32
  }
}

</mosaic_0001>

<bundles_post_ra>
// kernel: tpu_custom_call.1
= control target key start
LH: loop header
LB: loop body
LE: loop exit
PB: predicated region body
PF: predicated region fallthrough
CT: control target
= control target key end

     0   :  { %8 = vsyncpa [#allocation3], 0  ;;  %s1061_s0 = inlined_call_operand.hbm [shape: f32[2,4,2048], index: 0, kind: input, shape index: {}]   ;;  %s1062_s1 = inlined_call_operand.vmem [shape: f32[8,4], index: 1, kind: input, shape index: {}]   ;;  %s1063_s2 = inlined_call_operand.vmem [shape: f32[4,8], index: 2, kind: input, shape index: {}]   ;;  %s1064_s3 = inlined_call_operand.hbm [shape: f32[2,4,2048], index: 3, kind: output, shape index: {}]  }
   0x1   :  { %10 = vsyncpa [#allocation3 + $0x1], 0 }
   0x2   :  { %11 = vsyncpa [#allocation4], 0 }
   0x3   :  { %13 = vsyncpa [#allocation4 + $0x1], 0  ;;  %s889_s12 = smov 0   ;;  %s891_s13 = smov 0  }
   0x4   :  { %s893_s14 = smov 0   ;;  %s895_s15 = smov 0  }
   0x5   :  { %s897_s16 = smov 0   ;;  %s899_s17 = smov 0  }
   0x6   :  { %s901_s18 = smov 0   ;;  %s903_s19 = smov 0  }
   0x7 LB: > { %s634_s20 = sadd.s32 4294967295, %s864_s19   ;;  %s635_s21 = sadd.s32 4294967294, %s864_s19   ;;  %s864_s19 = sphi %s903_s19, %s19_s19   ;;  %s860_s18 = sphi %s901_s18, %s1080_s18   ;;  %s856_s17 = sphi %s899_s17, %s1079_s17   ;;  %s852_s16 = sphi %s897_s16, %s1078_s16   ;;  %s848_s15 = sphi %s895_s15, %s1077_s15   ;;  %s844_s14 = sphi %s893_s14, %s1076_s14   ;;  %s840_s13 = sphi %s891_s13, %s1075_s13   ;;  %s836_s12 = sphi %s889_s12, %s1074_s12  }
   0x8   : > { %s28_s22 = sadd.s32 1, %s856_s17  ;;  %s31_s23 = sadd.s32 1, %s860_s18 }
   0x9   : > { %p29_p0 = scmp.ge.s32.totalorder %s28_s22, 4  ;;  %s40_s24 = sadd.s32 1, %s844_s14 }
   0xa   : > { %p47_p1 = scmp.ne.s32.totalorder %s844_s14, %s840_s13  ;;  %p48_p2 = scmp.eq.s32.totalorder %s864_s19, 0 }
   0xb   : > { %s1082_s22 = smov (%p29_p0, %s28_s22), 0  ;;  %s1084_s23 = smov (!%p29_p0, %s31_s23), %s860_s18 }
   0xc   : > { %s36_s25 = ssub.s32 %s856_s17, %s1082_s22  ;;  %p942_p3 = por %p48_p2, %p47_p1 }
   0xd   : > { %p33_p4 = scmp.ge.s32.totalorder %s1084_s23, 2  ;;  %p53_p5 = scmp.ne.s32.totalorder %s840_s13, %s836_s12 }
   0xe   : > { %p54_p6 = scmp.eq.s32.totalorder %s634_s20, 0  ;;  %p121_p7 = scmp.eq.s32.totalorder %s634_s20, 7 }
   0xf   : > { %s1086_s23 = smov (%p33_p4, %s1084_s23), 0  ;;  %p127_p10 = scmp.eq.s32.totalorder %s635_s21, 7 }
  0x10   : > { %1067 = sst [smem:[#allocation8_spill]] %s1086_s23  ;;  %p950_p8 = por %p54_p6, %p53_p5 }
  0x11   : > { %p954_p9 = por %p121_p7, %p47_p1  ;;  %s35_s29 = ssub.s32 %s860_s18, %s1086_s23 }
  0x12   : > { %s37_s30 = sor.u32 %s36_s25, %s35_s29  ;;  %p960_p12 = por %p127_p10, %p53_p5 }
  0x13   : > { %p38_p11 = scmp.eq.s32.totalorder %s37_s30, 0  ;;  %p671_p13 = scmp.lt.s32.totalorder %s864_s19, 8 }
  0x14   : > { %s1070_s4 = scalar_select %p960_p12, 1, 0 }
  0x15   : > { %s153_s5 = sand.u32 1, %s844_s14   ;;  %s639_s8 = sshll.u32 %s856_s17, 2 }
  0x16   : > { %s967_s6 = scalar_select %p38_p11, %s844_s14, %s40_s24  }
  0x17   : > { %s638_s7 = sshll.u32 %s153_s5, 4  ;;  %s640_s9 = sshll.u32 %s860_s18, 4 }
  0x18   : > { %s157_s10 = scalar_lea.vmem [#allocation2], %s638_s7  ;;  %s163_s20 = sadd.s32 %s640_s9, %s639_s8 }
  0x19   : > { %s167_s11 = sshll.u32 %s157_s10, 4  ;;  %s641_s21 = sshll.u32 %s163_s20, 6  ;;  %s168_s11 = int_to_ptr.vmem [resolvable:$true] %s167_s11 }
  0x1a   : > { %p973_p0 = pnand %p671_p13, %p942_p3  ;;  %s165_s23 = scalar_lea.hbm %s1061_s0, %s641_s21 }
  0x1b   : > { %p642_p1 = scmp.ge.s32.totalorder %s864_s19, 1  ;;  %p172_p2 = scmp.lt.s32.totalorder %s864_s19, 9 }
  0x1c   : > { %s154_s24 = scalar_lea.sflag [#allocation3], %s153_s5  ;;  %p742_p4 = pneg %p973_p0 }
  0x1d   : > { %s753_s7 = scalar_lea.vmem %s168_s11, 256  ;;  %s866_s8 = smov [#allocation2]  }
  0x1e   : > { %p754_p5 = scmp.ne.s32.totalorder %s168_s11, %s753_s7  ;;  %s758_s26 = sshll.u32 %s866_s8, 4  ;;  %s759_s26 = int_to_ptr.vmem [resolvable:$false] %s758_s26 }
  0x1f   : > { %s760_s9 = scalar_lea.vmem %s759_s26, 512  ;;  %p761_p3 = scmp.lt.s32.totalorder %s168_s11, %s759_s26 }
  0x20   : > { %p756_p6 = pnand %p754_p5, %p742_p4  ;;  %p762_p10 = scmp.lt.s32.totalorder %s760_s9, %s753_s7 }
  0x22   : > { %p757_p7 = pneg %p756_p6  ;;  %p763_p11 = por %p762_p10, %p761_p3 }
  0x24   : > { %p764_p13 = pnand %p763_p11, %p757_p7 }
  0x26   : > { %767 = shalt.err (!%p764_p13)
}
  0x27   : > { %666 = dma.hbm_to_vmem [thread:$0]  (!%p973_p0), %s165_s23, 256, %s168_s11, %s154_s24  }
  0x28   : > { %p173_p12 = pnand %p642_p1, %p172_p2 }
  0x29   : > { %s991_s5 = sand.u32 (!%p173_p12), 1, %s840_s13  }
  0x2a   : > { %176 = sbr.rel (%p173_p12) target bundleno = 462 (0x1ce), region = 32  ;;  %s643_s10 = sshll.u32 (!%p173_p12), %s991_s5, 4 }
  0x2b   : > { %s179_s20 = scalar_lea.sflag (!%p173_p12), [#allocation3], %s991_s5  ;;  %s182_s21 = scalar_lea.vmem (!%p173_p12), [#allocation2], %s643_s10 }
  0x2f   : > { %827 = dma.done.wait (%p950_p8), %s179_s20, 256  }
  0x30   : > { %829 = vsyncadd (%p950_p8), %s179_s20, 4294967040  ;;  %v867_v0 = vmov 0.0   ;;  %v207_v1 = vld [vmem:[%s182_s21] sm:$0xff]  ;;  %vm218_vm0 = vcmask 1043456   ;;  %v208_v2 = vld [vmem:[%s182_s21 + $0x8] sm:$0xff]  ;;  %vm214_vm1 = vcmask 31744  }
  0x31   : > { %291 = vmatprep.mubr.f32.mxu0 %v867_v0  ;;  %362 = vmatprep.mubr.f32.mxu1 %v867_v0  ;;  %v212_v3 = vcombine.high %v207_v1, %v207_v1  ;;  %v213_v4 = vcombine.high %v208_v2, %v208_v2  ;;  %v209_v5 = vld [vmem:[%s1062_s1] sm:$0xff]  ;;  %vm374_vm2 = vcmask 64512   ;;  %s654_s29 = sshll.u32 %s848_s15, 2  ;;  %s655_s30 = sshll.u32 %s852_s16, 4 }
  0x32   : > { %v373_v14 = vld [vmem:[%s1063_s2] sm:$0xf]  ;;  %s543_s24 = sadd.s32 %s655_s30, %s654_s29  ;;  %s204_s8 = scalar_lea.vmem [#allocation5], %s643_s10 }
  0x33   : > { %645 = vmatprep.subr.msk.mxu0 %vm218_vm0, %v212_v3  ;;  %648 = vmatprep.subr.msk.mxu1 %vm218_vm0, %v213_v4  ;;  %s656_s7 = sshll.u32 %s543_s24, 6  ;;  %s547_s26 = sshll.u32 %s204_s8, 4  ;;  %s548_s26 = int_to_ptr.vmem [resolvable:$true] %s547_s26 }
  0x34   : > { %646 = vmatpush1.msk.msra.mxu0 %vm218_vm0, %v207_v1  ;;  %649 = vmatpush1.msk.msra.mxu1 %vm218_vm0, %v208_v2  ;;  %s1014_s21 = scalar_lea.hbm %s1064_s3, %s656_s7  ;;  %s531_s15 = scalar_lea.sflag [#allocation4], %s991_s5 }
  0x35   : > { %647 = vmatmul.mubr.msk.f32.vlgmr.msra.gmra.mxu0 %vm214_vm1, %v209_v5  ;;  %650 = vmatmul.mubr.msk.f32.vlgmr.msra.gmra.mxu1 %vm214_vm1, %v209_v5  ;;  %s768_s16 = scalar_lea.vmem %s548_s26, 256  ;;  %s868_s10 = smov [#allocation5]  }
  0x36   : > { %442 = vmatprep.mubr.f32.mxu0 %v867_v0  ;;  %513 = vmatprep.mubr.f32.mxu1 %v867_v0  ;;  %p769_p8 = scmp.ne.s32.totalorder %s548_s26, %s768_s16  ;;  %s772_s23 = sshll.u32 %s868_s10, 4  ;;  %s773_s23 = int_to_ptr.vmem [resolvable:$false] %s772_s23 }
  0x37   : > { %s774_s11 = scalar_lea.vmem %s773_s23, 512  ;;  %p775_p1 = scmp.lt.s32.totalorder %s548_s26, %s773_s23 }
  0x38   : > { %p770_p12 = pnand %p769_p8, %p954_p9  ;;  %p776_p2 = scmp.lt.s32.totalorder %s774_s11, %s768_s16 }
  0x3a   : > { %p771_p0 = pneg %p770_p12  ;;  %p777_p4 = por %p776_p2, %p775_p1 }
  0x3c   : > { %p778_p5 = pnand %p777_p4, %p771_p0 }
  0xf5   : > { %v293_v6 = vpop.f32.mrf.mxu0  ;;  %v364_v7 = vpop.f32.mrf.mxu1 }
  0xf6   : > { %v369_v12 = vmax.f32 %v293_v6, 0.0  ;;  %v371_v13 = vmax.f32 %v364_v7, 0.0 }
  0xf7   : > { %v295_v8 = vpop.f32.mrf.mxu0  ;;  %v366_v9 = vpop.f32.mrf.mxu1 }
  0xf8   : > { %v370_v10 = vmax.f32 %v295_v8, 0.0  ;;  %v372_v11 = vmax.f32 %v366_v9, 0.0 }
  0xfa   : > { %408 = vmatprep.subr.mxu0 %v370_v10  ;;  %479 = vmatprep.subr.mxu1 %v372_v11 }
  0xfb   : > { %409 = vmatpush1.msra.mxu0 %v369_v12  ;;  %480 = vmatpush1.msra.mxu1 %v371_v13 }
  0xfc   : > { %651 = vmatmul.mubr.msk.f32.vlgmr.msra.gmra.mxu0 %vm374_vm2, %v373_v14  ;;  %652 = vmatmul.mubr.msk.f32.vlgmr.msra.gmra.mxu1 %vm374_vm2, %v373_v14 }
 0x1bc   : > { %v444_v15 = vpop.f32.mrf.mxu0  ;;  %v515_v16 = vpop.f32.mrf.mxu1 }
 0x1be   : > { %v446_v17 = vpop.f32.mrf.mxu0  ;;  %v517_v18 = vpop.f32.mrf.mxu1 }
 0x1bf   : > { %v524_v19 = vcombine.low %v444_v15, %v446_v17  ;;  %v525_v20 = vcombine.low %v515_v16, %v517_v18 }
 0x1c1   : > { %528 = vst [vmem:[%s204_s8] sm:$0xff] %v524_v19  ;;  %529 = vst [vmem:[%s204_s8 + $0x8] sm:$0xff] %v525_v20 }
 0x1c2   : > { %781 = shalt.err (!%p778_p5)
}
 0x1c3   : > { %s782_s27 = scalar_lea.hbm %s1014_s21, 256  ;;  %s786_s29 = scalar_lea.hbm %s1064_s3, 2048 }
 0x1c4   : > { %p783_p6 = scmp.ne.s32.totalorder %s1014_s21, %s782_s27  ;;  %p787_p10 = scmp.lt.s32.totalorder %s1014_s21, %s1064_s3 }
 0x1c5   : > { %p788_p11 = scmp.lt.s32.totalorder %s786_s29, %s782_s27 }
 0x1c6   : > { %p784_p7 = pnand %p783_p6, %p954_p9 }
 0x1c7   : > { %p789_p13 = por %p788_p11, %p787_p10 }
 0x1c8   : > { %p785_p3 = pneg %p784_p7 }
 0x1ca   : > { %p790_p8 = pnand %p789_p13, %p785_p3 }
 0x1cc   : > { %793 = shalt.err (!%p790_p8)
}
 0x1cd   : > { %661 = dma.vmem_to_hbm [thread:$0]  (%p954_p9), %s548_s26, 256, %s1014_s21, %s531_s15  }
 0x1ce PF: > { %p672_p12 = scmp.ge.s32.totalorder %s864_s19, 2  ;;  %s559_s7 = sand.u32 1, %s836_s12  }
 0x1cf   : > { %p1072_p0 = scmp.ne.s32.totalorder %s1070_s4, 0  ;;  %s560_s8 = scalar_lea.sflag [#allocation4], %s559_s7 }
 0x1d1   : > { %p668_p1 = pnand %p672_p12, %p1072_p0 }
 0x1d3   : > { %p669_p2 = pneg %p668_p1 }
 0x1d5   : > { %831 = dma.done.wait (%p669_p2), %s560_s8, 256  }
 0x1d6   : > { %833 = vsyncadd (%p669_p2), %s560_s8, 4294967040  ;;  %s19_s19 = sadd.s32 1, %s864_s19   ;;  %s1073_s28 = sld [smem:[#allocation8_spill]] }
 0x1d7   : > { %p16_p4 = scmp.ge.s32.totalorder %s19_s19, 10   ;;  %s1074_s12 = smov %s840_s13 }
 0x1d8   : > { %s1075_s13 = smov %s844_s14  ;;  %s1076_s14 = smov %s967_s6 }
 0x1d9   : > { %s1077_s15 = smov %s856_s17  ;;  %s1078_s16 = smov %s860_s18 }
 0x1da   : > { %s1079_s17 = smov %s1082_s22  ;;  %18 = sbr.rel (!%p16_p4) target bundleno = 7 (0x7), region = 77 }
 0x1dc   : > { %s1080_s18 = smov %s1073_s28 }
 0x1df   :  { %565 = vsyncpa [#allocation3], 1 }
 0x1e0   :  { %567 = vsyncpa [#allocation3 + $0x1], 1 }
 0x1e1   :  { %568 = vsyncpa [#allocation4], 1 }
 0x1e2   :  { %570 = vsyncpa [#allocation4 + $0x1], 1 }

</bundles_post_ra>
